<compile_context>
chip_gen: v7x
topology: tpu7x:2x2x1
jax: 0.10.0
libtpu: 0.0.40
codegen_flags: <defaults>
</compile_context>

<pallas_src>
import math
from functools import partial

import jax
import jax.numpy as jnp
from jax import lax
from jax.experimental import pallas as pl
from jax.experimental.pallas import tpu as pltpu


# Tile caps (fit comfortably inside v7x's 64 MiB VMEM; fine on v5e/v6e).
_TM, _TN, _TK = 256, 256, 512
_VMEM_LIMIT = 32 * 1024 * 1024


def _tile(dim, cap):
    """Full dim for small sizes, else `cap` when it divides evenly."""
    if dim <= cap:
        return dim
    if dim % cap == 0:
        return cap
    return dim  # fallback: single block for odd sizes


# ----------------------- fused Q/K/V projection ------------------------------

def _qkv_proj_kernel(kx_ref, vx_ref, wq_ref, wk_ref, wv_ref,
                     bq_ref, bk_ref, bv_ref,
                     q_out, k_out, v_out,
                     acc_q, acc_k, acc_v):
    kidx = pl.program_id(1)

    @pl.when(kidx == 0)
    def _init():
        acc_q[...] = jnp.zeros_like(acc_q)
        acc_k[...] = jnp.zeros_like(acc_k)
        acc_v[...] = jnp.zeros_like(acc_v)

    kx = kx_ref[...]          # shared activation tile for the q and k projections
    vx = vx_ref[...]
    acc_q[...] += jnp.dot(kx, wq_ref[...], preferred_element_type=jnp.float32)
    acc_k[...] += jnp.dot(kx, wk_ref[...], preferred_element_type=jnp.float32)
    acc_v[...] += jnp.dot(vx, wv_ref[...], preferred_element_type=jnp.float32)

    @pl.when(kidx == pl.num_programs(1) - 1)
    def _finalize():
        q_out[...] = (acc_q[...] + bq_ref[...]).astype(q_out.dtype)
        k_out[...] = (acc_k[...] + bk_ref[...]).astype(k_out.dtype)
        v_out[...] = (acc_v[...] + bv_ref[...]).astype(v_out.dtype)


def qkv_proj(kx, vx, wq, wk, wv, bq, bk, bv):
    """kx, vx: (M, D_in); w*: (D_in, D_out) pre-transposed; b*: (1, D_out).
    Note q is projected from the *k* input (module quirk)."""
    M, D_in = kx.shape
    D_out = wq.shape[1]
    tm, tk = _tile(M, _TM), _tile(D_in, _TK)
    grid = (M // tm, D_in // tk)

    x_spec = pl.BlockSpec((tm, tk), lambda i, k: (i, k))
    w_spec = pl.BlockSpec((tk, D_out), lambda i, k: (k, 0))
    b_spec = pl.BlockSpec((1, D_out), lambda i, k: (0, 0))
    o_spec = pl.BlockSpec((tm, D_out), lambda i, k: (i, 0))
    o_shape = jax.ShapeDtypeStruct((M, D_out), jnp.float32)

    return pl.pallas_call(
        _qkv_proj_kernel,
        grid=grid,
        in_specs=[x_spec, x_spec, w_spec, w_spec, w_spec,
                  b_spec, b_spec, b_spec],
        out_specs=(o_spec, o_spec, o_spec),
        out_shape=(o_shape, o_shape, o_shape),
        scratch_shapes=[pltpu.VMEM((tm, D_out), jnp.float32)] * 3,
        compiler_params=pltpu.CompilerParams(
            dimension_semantics=("parallel", "arbitrary"),
            vmem_limit_bytes=_VMEM_LIMIT),
    )(kx, vx, wq, wk, wv, bq, bk, bv)


# ----------------------------- tiled linear ----------------------------------

def _linear_kernel(x_ref, w_ref, b_ref, o_ref, acc_ref):
    kidx = pl.program_id(2)

    @pl.when(kidx == 0)
    def _init():
        acc_ref[...] = jnp.zeros_like(acc_ref)

    acc_ref[...] += jnp.dot(x_ref[...], w_ref[...],
                            preferred_element_type=jnp.float32)

    @pl.when(kidx == pl.num_programs(2) - 1)
    def _finalize():
        o_ref[...] = (acc_ref[...] + b_ref[...]).astype(o_ref.dtype)


def linear(x, w, b):
    """x: (M, D_in), w: (D_in, D_out) pre-transposed, b: (1, D_out)."""
    M, D_in = x.shape
    D_out = w.shape[1]
    tm, tn, tk = _tile(M, _TM), _tile(D_out, _TN), _tile(D_in, _TK)
    grid = (M // tm, D_out // tn, D_in // tk)
    return pl.pallas_call(
        _linear_kernel,
        grid=grid,
        in_specs=[pl.BlockSpec((tm, tk), lambda i, j, k: (i, k)),
                  pl.BlockSpec((tk, tn), lambda i, j, k: (k, j)),
                  pl.BlockSpec((1, tn), lambda i, j, k: (0, j))],
        out_specs=pl.BlockSpec((tm, tn), lambda i, j, k: (i, j)),
        out_shape=jax.ShapeDtypeStruct((M, D_out), jnp.float32),
        scratch_shapes=[pltpu.VMEM((tm, tn), jnp.float32)],
        compiler_params=pltpu.CompilerParams(
            dimension_semantics=("parallel", "parallel", "arbitrary"),
            vmem_limit_bytes=_VMEM_LIMIT),
    )(x, w, b)


# ------------------------ scaled dot-product attention -----------------------

def _sdpa_kernel(q_ref, k_ref, v_ref, o_ref, a_ref, *,
                 n_head, d_k, scale, causal):
    # One batch element per grid step.  Refs: q/k/v/o (1, T, D); a (1, H, T, T).
    T = q_ref.shape[1]
    if causal:
        row = lax.broadcasted_iota(jnp.int32, (T, T), 0)
        col = lax.broadcasted_iota(jnp.int32, (T, T), 1)
        # torch.triu(ones, diagonal=1) as a boolean fill mask -> col > row.
        neg = jnp.where(col > row, jnp.float32(-1e30), jnp.float32(0.0))

    for h in range(n_head):                 # static, unrolled per-head loop
        lo = h * d_k
        q_h = q_ref[0, :, lo:lo + d_k]      # (T, d_k) static lane slices
        k_h = k_ref[0, :, lo:lo + d_k]
        v_h = v_ref[0, :, lo:lo + d_k]

        # q_h @ k_h^T via dot_general contracting the last dims of both — no
        # materialized K transpose (keeps the XLU out of the hot loop).
        s = lax.dot_general(q_h, k_h, (((1,), (1,)), ((), ())),
                            preferred_element_type=jnp.float32) * scale
        if causal:
            s = s + neg
        m = jnp.max(s, axis=-1, keepdims=True)
        p = jnp.exp(s - m)
        denom = jnp.sum(p, axis=-1, keepdims=True)
        attn = p * pl.reciprocal(denom, approx=True)     # EUP vrcp

        a_ref[0, h] = attn.astype(a_ref.dtype)
        out_h = jnp.dot(attn, v_h, preferred_element_type=jnp.float32)
        o_ref[0, :, lo:lo + d_k] = out_h.astype(o_ref.dtype)


def sdpa(q, k, v, n_head, causal):
    """q/k/v: (B, T, D) with heads packed in the last axis (D = H*d_k).
    Returns (context (B, T, D), attn (B, H, T, T))."""
    B, T, D = q.shape
    d_k = D // n_head
    scale = 1.0 / math.sqrt(d_k)
    kernel = partial(_sdpa_kernel, n_head=n_head, d_k=d_k, scale=scale,
                     causal=causal)
    qkv_spec = pl.BlockSpec((1, T, D), lambda b: (b, 0, 0))
    return pl.pallas_call(
        kernel,
        grid=(B,),
        in_specs=[qkv_spec, qkv_spec, qkv_spec],
        out_specs=(qkv_spec,
                   pl.BlockSpec((1, n_head, T, T), lambda b: (b, 0, 0, 0))),
        out_shape=(jax.ShapeDtypeStruct((B, T, D), jnp.float32),
                   jax.ShapeDtypeStruct((B, n_head, T, T), jnp.float32)),
        compiler_params=pltpu.CompilerParams(
            dimension_semantics=("parallel",),
            vmem_limit_bytes=_VMEM_LIMIT),
    )(q, k, v)


# ------------------------------ module wrapper --------------------------------

class MultiHeadAttentionPallas:
    def __init__(self, d_model, num_heads, context_length, key,
                 dropout=0.1, mask=False):
        assert d_model % num_heads == 0
        self.d_model = d_model
        self.n_head = num_heads
        self.d_k = d_model // num_heads
        self.context_length = context_length
        self.enable_mask = mask

        ks = jax.random.split(key, 8)
        bound = 1.0 / math.sqrt(d_model)

        def init_linear(kw, kb):
            # stored directly in (in, out) layout -> kernels do x @ W, no .T
            w = jax.random.uniform(kw, (d_model, d_model), jnp.float32,
                                   -bound, bound)
            b = jax.random.uniform(kb, (1, d_model), jnp.float32,
                                   -bound, bound)
            return w, b

        self.w_q, self.b_q = init_linear(ks[0], ks[1])
        self.w_k, self.b_k = init_linear(ks[2], ks[3])
        self.w_v, self.b_v = init_linear(ks[4], ks[5])
        self.w_o, self.b_o = init_linear(ks[6], ks[7])

    def __call__(self, q, k, v):
        # `q` is intentionally unused: the reference forward computes w_q(k).
        del q
        B, T, D = k.shape

        kx = k.reshape(B * T, D)
        vx = v.reshape(B * T, D)

        # Fused Q/K/V projection (single pallas_call; k activation read once).
        qp, kp, vp = qkv_proj(kx, vx, self.w_q, self.w_k, self.w_v,
                              self.b_q, self.b_k, self.b_v)

        # Only free reshapes below — no HBM transposes between kernels.
        qp = qp.reshape(B, T, D)
        kp = kp.reshape(B, T, D)
        vp = vp.reshape(B, T, D)

        ctx, attn = sdpa(qp, kp, vp, self.n_head, causal=self.enable_mask)

        out = linear(ctx.reshape(B * T, D), self.w_o, self.b_o)
        out = out.reshape(B, T, D)
        # dropout: identity (eval mode)
        return out, attn


# -------------------------------- reference -----------------------------------

def reference(mha, q, k, v):
    del q
    B, T, D = k.shape
    H, d_k = mha.n_head, mha.d_k

    def lin(x, w, b):
        return x @ w + b

    qp = lin(k, mha.w_q, mha.b_q).reshape(B, T, H, d_k).transpose(0, 2, 1, 3)
    kp = lin(k, mha.w_k, mha.b_k).reshape(B, T, H, d_k).transpose(0, 2, 1, 3)
    vp = lin(v, mha.w_v, mha.b_v).reshape(B, T, H, d_k).transpose(0, 2, 1, 3)
    scores = jnp.einsum('bhqd,bhkd->bhqk', qp, kp) / math.sqrt(d_k)
    if mha.enable_mask:
        causal = jnp.triu(jnp.ones((T, T), bool), k=1)
        scores = jnp.where(causal, -1e30, scores)
    attn = jax.nn.softmax(scores, axis=-1)
    out = jnp.einsum('bhqk,bhkd->bhqd', attn, vp)
    out = out.transpose(0, 2, 1, 3).reshape(B, T, D)
    out = lin(out, mha.w_o, mha.b_o)
    return out, attn


# ----------------------------------- main --------------------------------------

if __name__ == "__main__":
    key = jax.random.PRNGKey(0)
    k_param, k_q, k_k, k_v = jax.random.split(key, 4)

    B, T, D, H = 2, 8, 32, 4
    mha = MultiHeadAttentionPallas(d_model=D, num_heads=H, context_length=T,
                                   key=k_param, mask=False)

    q = jax.random.normal(k_q, (B, T, D), jnp.float32)
    k = jax.random.normal(k_k, (B, T, D), jnp.float32)
    v = jax.random.normal(k_v, (B, T, D), jnp.float32)

    out, attn = mha(q, k, v)
    out = jax.block_until_ready(out)
    attn = jax.block_until_ready(attn)

    out_ref, attn_ref = reference(mha, q, k, v)
    assert out.shape == (B, T, D) and attn.shape == (B, H, T, T)
    # approx=True softmax reciprocal -> slightly looser tolerance than exact f32.
    assert jnp.allclose(attn, attn_ref, atol=2e-3, rtol=2e-3), \
        float(jnp.max(jnp.abs(attn - attn_ref)))
    assert jnp.allclose(out, out_ref, atol=2e-3, rtol=2e-3), \
        float(jnp.max(jnp.abs(out - out_ref)))

    print("KERNEL_OK")
</pallas_src>

<mosaic_0001>
module attributes {stable_mosaic.version = 11 : i64} {
  func.func @_qkv_proj_kernel(%arg0: i32, %arg1: i32, %arg2: memref<16x32xf32, #tpu.memory_space<vmem>>, %arg3: memref<16x32xf32, #tpu.memory_space<vmem>>, %arg4: memref<32x32xf32, #tpu.memory_space<vmem>>, %arg5: memref<32x32xf32, #tpu.memory_space<vmem>>, %arg6: memref<32x32xf32, #tpu.memory_space<vmem>>, %arg7: memref<1x32xf32, #tpu.memory_space<vmem>>, %arg8: memref<1x32xf32, #tpu.memory_space<vmem>>, %arg9: memref<1x32xf32, #tpu.memory_space<vmem>>, %arg10: memref<16x32xf32, #tpu.memory_space<vmem>>, %arg11: memref<16x32xf32, #tpu.memory_space<vmem>>, %arg12: memref<16x32xf32, #tpu.memory_space<vmem>>, %arg13: memref<16x32xf32, #tpu.memory_space<vmem>>, %arg14: memref<16x32xf32, #tpu.memory_space<vmem>>, %arg15: memref<16x32xf32, #tpu.memory_space<vmem>>) attributes {dimension_semantics = [#tpu.dimension_semantics<parallel>, #tpu.dimension_semantics<arbitrary>], iteration_bounds = array<i64: 1, 1>, scalar_prefetch = 0 : i64, scratch_operands = 3 : i64, tpu.core_type = #tpu.core_type<tc>, window_params = [{transform_indices = @transform_0, window_bounds = array<i64: 16, 32>}, {transform_indices = @transform_1, window_bounds = array<i64: 16, 32>}, {transform_indices = @transform_2, window_bounds = array<i64: 32, 32>}, {transform_indices = @transform_3, window_bounds = array<i64: 32, 32>}, {transform_indices = @transform_4, window_bounds = array<i64: 32, 32>}, {pipeline_mode = #tpu.pipeline_mode<synchronous>, transform_indices = @transform_5, window_bounds = array<i64: 1, 32>}, {pipeline_mode = #tpu.pipeline_mode<synchronous>, transform_indices = @transform_6, window_bounds = array<i64: 1, 32>}, {pipeline_mode = #tpu.pipeline_mode<synchronous>, transform_indices = @transform_7, window_bounds = array<i64: 1, 32>}, {transform_indices = @transform_8, window_bounds = array<i64: 16, 32>}, {transform_indices = @transform_9, window_bounds = array<i64: 16, 32>}, {transform_indices = @transform_10, window_bounds = array<i64: 16, 32>}]} {
    %c0_i32 = arith.constant 0 : i32
    %0 = arith.cmpi eq, %arg1, %c0_i32 : i32
    %1 = arith.extui %0 : i1 to i32
    %c0_i32_0 = arith.constant 0 : i32
    %2 = arith.cmpi ne, %1, %c0_i32_0 : i32
    scf.if %2 {
      %cst_26 = arith.constant 0.000000e+00 : f32
      %23 = vector.broadcast %cst_26 : f32 to vector<16x32xf32>
      %c0_27 = arith.constant 0 : index
      %c0_28 = arith.constant 0 : index
      %24 = vector.load %arg13[%c0_27, %c0_28] : memref<16x32xf32, #tpu.memory_space<vmem>>, vector<16x32xf32>
      tpu.vector_store %arg13[%c0_27, %c0_28], %23 {strides = array<i32>} : memref<16x32xf32, #tpu.memory_space<vmem>>, vector<16x32xf32>,
      %cst_29 = arith.constant 0.000000e+00 : f32
      %25 = vector.broadcast %cst_29 : f32 to vector<16x32xf32>
      %c0_30 = arith.constant 0 : index
      %c0_31 = arith.constant 0 : index
      %26 = vector.load %arg14[%c0_30, %c0_31] : memref<16x32xf32, #tpu.memory_space<vmem>>, vector<16x32xf32>
      tpu.vector_store %arg14[%c0_30, %c0_31], %25 {strides = array<i32>} : memref<16x32xf32, #tpu.memory_space<vmem>>, vector<16x32xf32>,
      %cst_32 = arith.constant 0.000000e+00 : f32
      %27 = vector.broadcast %cst_32 : f32 to vector<16x32xf32>
      %c0_33 = arith.constant 0 : index
      %c0_34 = arith.constant 0 : index
      %28 = vector.load %arg15[%c0_33, %c0_34] : memref<16x32xf32, #tpu.memory_space<vmem>>, vector<16x32xf32>
      tpu.vector_store %arg15[%c0_33, %c0_34], %27 {strides = array<i32>} : memref<16x32xf32, #tpu.memory_space<vmem>>, vector<16x32xf32>,
    } else {
    }
    %c0 = arith.constant 0 : index
    %c0_1 = arith.constant 0 : index
    %3 = vector.load %arg2[%c0, %c0_1] : memref<16x32xf32, #tpu.memory_space<vmem>>, vector<16x32xf32>
    %c0_2 = arith.constant 0 : index
    %c0_3 = arith.constant 0 : index
    %4 = vector.load %arg3[%c0_2, %c0_3] : memref<16x32xf32, #tpu.memory_space<vmem>>, vector<16x32xf32>
    %c0_4 = arith.constant 0 : index
    %c0_5 = arith.constant 0 : index
    %5 = vector.load %arg13[%c0_4, %c0_5] : memref<16x32xf32, #tpu.memory_space<vmem>>, vector<16x32xf32>
    %c0_6 = arith.constant 0 : index
    %c0_7 = arith.constant 0 : index
    %6 = vector.load %arg4[%c0_6, %c0_7] : memref<32x32xf32, #tpu.memory_space<vmem>>, vector<32x32xf32>
    %cst = arith.constant dense<0.000000e+00> : vector<16x32xf32>
    %7 = tpu.matmul %3, %6, %cst {dimension_numbers = #tpu.dot_dimension_numbers<[1], [0], [0], [1], [0, 0, 1, 1], [], []>} : vector<16x32xf32>, vector<32x32xf32>, vector<16x32xf32> -> vector<16x32xf32>
    %8 = arith.addf %5, %7 : vector<16x32xf32>
    %c0_8 = arith.constant 0 : index
    %c0_9 = arith.constant 0 : index
    %9 = vector.load %arg13[%c0_8, %c0_9] : memref<16x32xf32, #tpu.memory_space<vmem>>, vector<16x32xf32>
    tpu.vector_store %arg13[%c0_8, %c0_9], %8 {strides = array<i32>} : memref<16x32xf32, #tpu.memory_space<vmem>>, vector<16x32xf32>,
    %c0_10 = arith.constant 0 : index
    %c0_11 = arith.constant 0 : index
    %10 = vector.load %arg14[%c0_10, %c0_11] : memref<16x32xf32, #tpu.memory_space<vmem>>, vector<16x32xf32>
    %c0_12 = arith.constant 0 : index
    %c0_13 = arith.constant 0 : index
    %11 = vector.load %arg5[%c0_12, %c0_13] : memref<32x32xf32, #tpu.memory_space<vmem>>, vector<32x32xf32>
    %cst_14 = arith.constant dense<0.000000e+00> : vector<16x32xf32>
    %12 = tpu.matmul %3, %11, %cst_14 {dimension_numbers = #tpu.dot_dimension_numbers<[1], [0], [0], [1], [0, 0, 1, 1], [], []>} : vector<16x32xf32>, vector<32x32xf32>, vector<16x32xf32> -> vector<16x32xf32>
    %13 = arith.addf %10, %12 : vector<16x32xf32>
    %c0_15 = arith.constant 0 : index
    %c0_16 = arith.constant 0 : index
    %14 = vector.load %arg14[%c0_15, %c0_16] : memref<16x32xf32, #tpu.memory_space<vmem>>, vector<16x32xf32>
    tpu.vector_store %arg14[%c0_15, %c0_16], %13 {strides = array<i32>} : memref<16x32xf32, #tpu.memory_space<vmem>>, vector<16x32xf32>,
    %c0_17 = arith.constant 0 : index
    %c0_18 = arith.constant 0 : index
    %15 = vector.load %arg15[%c0_17, %c0_18] : memref<16x32xf32, #tpu.memory_space<vmem>>, vector<16x32xf32>
    %c0_19 = arith.constant 0 : index
    %c0_20 = arith.constant 0 : index
    %16 = vector.load %arg6[%c0_19, %c0_20] : memref<32x32xf32, #tpu.memory_space<vmem>>, vector<32x32xf32>
    %cst_21 = arith.constant dense<0.000000e+00> : vector<16x32xf32>
    %17 = tpu.matmul %4, %16, %cst_21 {dimension_numbers = #tpu.dot_dimension_numbers<[1], [0], [0], [1], [0, 0, 1, 1], [], []>} : vector<16x32xf32>, vector<32x32xf32>, vector<16x32xf32> -> vector<16x32xf32>
    %18 = arith.addf %15, %17 : vector<16x32xf32>
    %c0_22 = arith.constant 0 : index
    %c0_23 = arith.constant 0 : index
    %19 = vector.load %arg15[%c0_22, %c0_23] : memref<16x32xf32, #tpu.memory_space<vmem>>, vector<16x32xf32>
    tpu.vector_store %arg15[%c0_22, %c0_23], %18 {strides = array<i32>} : memref<16x32xf32, #tpu.memory_space<vmem>>, vector<16x32xf32>,
    %c0_i32_24 = arith.constant 0 : i32
    %20 = arith.cmpi eq, %arg1, %c0_i32_24 : i32
    %21 = arith.extui %20 : i1 to i32
    %c0_i32_25 = arith.constant 0 : i32
    %22 = arith.cmpi ne, %21, %c0_i32_25 : i32
    scf.if %22 {
      %c0_26 = arith.constant 0 : index
      %c0_27 = arith.constant 0 : index
      %23 = vector.load %arg13[%c0_26, %c0_27] : memref<16x32xf32, #tpu.memory_space<vmem>>, vector<16x32xf32>
      %c0_28 = arith.constant 0 : index
      %c0_29 = arith.constant 0 : index
      %24 = vector.load %arg7[%c0_28, %c0_29] : memref<1x32xf32, #tpu.memory_space<vmem>>, vector<1x32xf32>
      %25 = vector.broadcast %24 : vector<1x32xf32> to vector<16x32xf32>
      %26 = arith.addf %23, %25 : vector<16x32xf32>
      %c0_30 = arith.constant 0 : index
      %c0_31 = arith.constant 0 : index
      %27 = vector.load %arg10[%c0_30, %c0_31] : memref<16x32xf32, #tpu.memory_space<vmem>>, vector<16x32xf32>
      tpu.vector_store %arg10[%c0_30, %c0_31], %26 {strides = array<i32>} : memref<16x32xf32, #tpu.memory_space<vmem>>, vector<16x32xf32>,
      %c0_32 = arith.constant 0 : index
      %c0_33 = arith.constant 0 : index
      %28 = vector.load %arg14[%c0_32, %c0_33] : memref<16x32xf32, #tpu.memory_space<vmem>>, vector<16x32xf32>
      %c0_34 = arith.constant 0 : index
      %c0_35 = arith.constant 0 : index
      %29 = vector.load %arg8[%c0_34, %c0_35] : memref<1x32xf32, #tpu.memory_space<vmem>>, vector<1x32xf32>
      %30 = vector.broadcast %29 : vector<1x32xf32> to vector<16x32xf32>
      %31 = arith.addf %28, %30 : vector<16x32xf32>
      %c0_36 = arith.constant 0 : index
      %c0_37 = arith.constant 0 : index
      %32 = vector.load %arg11[%c0_36, %c0_37] : memref<16x32xf32, #tpu.memory_space<vmem>>, vector<16x32xf32>
      tpu.vector_store %arg11[%c0_36, %c0_37], %31 {strides = array<i32>} : memref<16x32xf32, #tpu.memory_space<vmem>>, vector<16x32xf32>,
      %c0_38 = arith.constant 0 : index
      %c0_39 = arith.constant 0 : index
      %33 = vector.load %arg15[%c0_38, %c0_39] : memref<16x32xf32, #tpu.memory_space<vmem>>, vector<16x32xf32>
      %c0_40 = arith.constant 0 : index
      %c0_41 = arith.constant 0 : index
      %34 = vector.load %arg9[%c0_40, %c0_41] : memref<1x32xf32, #tpu.memory_space<vmem>>, vector<1x32xf32>
      %35 = vector.broadcast %34 : vector<1x32xf32> to vector<16x32xf32>
      %36 = arith.addf %33, %35 : vector<16x32xf32>
      %c0_42 = arith.constant 0 : index
      %c0_43 = arith.constant 0 : index
      %37 = vector.load %arg12[%c0_42, %c0_43] : memref<16x32xf32, #tpu.memory_space<vmem>>, vector<16x32xf32>
      tpu.vector_store %arg12[%c0_42, %c0_43], %36 {strides = array<i32>} : memref<16x32xf32, #tpu.memory_space<vmem>>, vector<16x32xf32>,
    } else {
    }
    return
  }
  func.func @transform_0(%arg0: i32, %arg1: i32) -> (i32, i32) {
    %c0_i32 = arith.constant 0 : i32
    return %arg0, %arg1 : i32, i32
  }
  func.func @transform_1(%arg0: i32, %arg1: i32) -> (i32, i32) {
    %c0_i32 = arith.constant 0 : i32
    return %arg0, %arg1 : i32, i32
  }
  func.func @transform_2(%arg0: i32, %arg1: i32) -> (i32, i32) {
    %c0_i32 = arith.constant 0 : i32
    %c0_i32_0 = arith.constant 0 : i32
    return %arg1, %c0_i32 : i32, i32
  }
  func.func @transform_3(%arg0: i32, %arg1: i32) -> (i32, i32) {
    %c0_i32 = arith.constant 0 : i32
    %c0_i32_0 = arith.constant 0 : i32
    return %arg1, %c0_i32 : i32, i32
  }
  func.func @transform_4(%arg0: i32, %arg1: i32) -> (i32, i32) {
    %c0_i32 = arith.constant 0 : i32
    %c0_i32_0 = arith.constant 0 : i32
    return %arg1, %c0_i32 : i32, i32
  }
  func.func @transform_5(%arg0: i32, %arg1: i32) -> (i32, i32) {
    %c0_i32 = arith.constant 0 : i32
    %c0_i32_0 = arith.constant 0 : i32
    %c0_i32_1 = arith.constant 0 : i32
    return %c0_i32, %c0_i32_0 : i32, i32
  }
  func.func @transform_6(%arg0: i32, %arg1: i32) -> (i32, i32) {
    %c0_i32 = arith.constant 0 : i32
    %c0_i32_0 = arith.constant 0 : i32
    %c0_i32_1 = arith.constant 0 : i32
    return %c0_i32, %c0_i32_0 : i32, i32
  }
  func.func @transform_7(%arg0: i32, %arg1: i32) -> (i32, i32) {
    %c0_i32 = arith.constant 0 : i32
    %c0_i32_0 = arith.constant 0 : i32
    %c0_i32_1 = arith.constant 0 : i32
    return %c0_i32, %c0_i32_0 : i32, i32
  }
  func.func @transform_8(%arg0: i32, %arg1: i32) -> (i32, i32) {
    %c0_i32 = arith.constant 0 : i32
    %c0_i32_0 = arith.constant 0 : i32
    return %arg0, %c0_i32 : i32, i32
  }
  func.func @transform_9(%arg0: i32, %arg1: i32) -> (i32, i32) {
    %c0_i32 = arith.constant 0 : i32
    %c0_i32_0 = arith.constant 0 : i32
    return %arg0, %c0_i32 : i32, i32
  }
  func.func @transform_10(%arg0: i32, %arg1: i32) -> (i32, i32) {
    %c0_i32 = arith.constant 0 : i32
    %c0_i32_0 = arith.constant 0 : i32
    return %arg0, %c0_i32 : i32, i32
  }
}

</mosaic_0001>

<bundles_post_ra>
// kernel: tpu_custom_call.1
= control target key start
LH: loop header
LB: loop body
LE: loop exit
PB: predicated region body
PF: predicated region fallthrough
CT: control target
= control target key end

     0   :  { %16 = vsyncpa [#allocation6], 0  ;;  %s998_s0 = inlined_call_operand.hbm [shape: f32[16,32], index: 0, kind: input, shape index: {}]   ;;  %s999_s1 = inlined_call_operand.hbm [shape: f32[16,32], index: 1, kind: input, shape index: {}]   ;;  %s1000_s2 = inlined_call_operand.hbm [shape: f32[32,32], index: 2, kind: input, shape index: {}]   ;;  %s1001_s3 = inlined_call_operand.hbm [shape: f32[32,32], index: 3, kind: input, shape index: {}]   ;;  %s1002_s4 = inlined_call_operand.hbm [shape: f32[32,32], index: 4, kind: input, shape index: {}]   ;;  %s1003_s5 = inlined_call_operand.vmem [shape: f32[1,32], index: 5, kind: input, shape index: {}]   ;;  %s1004_s6 = inlined_call_operand.vmem [shape: f32[1,32], index: 6, kind: input, shape index: {}]   ;;  %s1005_s7 = inlined_call_operand.vmem [shape: f32[1,32], index: 7, kind: input, shape index: {}]   ;;  %s1006_s8 = inlined_call_operand.hbm [shape: f32[16,32], index: 8, kind: output, shape index: {0}]   ;;  %s1007_s9 = inlined_call_operand.hbm [shape: f32[16,32], index: 9, kind: output, shape index: {1}]   ;;  %s1008_s10 = inlined_call_operand.hbm [shape: f32[16,32], index: 10, kind: output, shape index: {2}]  }
   0x1   :  { %17 = vsyncpa [#allocation9], 0 }
   0x2   :  { %18 = vsyncpa [#allocation12], 0 }
   0x3   :  { %19 = vsyncpa [#allocation7], 0 }
   0x4   :  { %20 = vsyncpa [#allocation16], 0  ;;  %s758_s13 = smov [#allocation8]   ;;  %s759_s15 = smov [#allocation11]  }
   0x5   :  { %s38_s14 = sshll.u32 %s758_s13, 4  ;;  %s62_s16 = sshll.u32 %s759_s15, 4  ;;  %s39_s14 = int_to_ptr.vmem [resolvable:$true] %s38_s14  ;;  %s824_s16 = int_to_ptr.vmem [resolvable:$true] %s62_s16 }
   0x6   :  { %s572_s19 = scalar_lea.hbm %s999_s1, 256 }
   0x7   :  { %p573_p0 = scmp.ne.s32.totalorder %s999_s1, %s572_s19  ;;  %p576_p1 = scmp.lt.u32.totalorder %s572_s19, %s999_s1 }
   0x9   :  { %p578_p2 = pnand %p576_p1, %p573_p0 }
   0xb   :  { %581 = shalt.err (!%p578_p2)
}
   0xc   :  { %s582_s24 = scalar_lea.vmem %s39_s14, 256  ;;  %p587_p4 = scmp.lt.s32.totalorder %s39_s14, %s39_s14 }
   0xd   :  { %p583_p3 = scmp.ne.s32.totalorder %s39_s14, %s582_s24  ;;  %p588_p5 = scmp.lt.s32.totalorder %s582_s24, %s582_s24 }
   0xf   :  { %p589_p6 = por %p588_p5, %p587_p4 }
  0x11   :  { %p590_p7 = pnand %p589_p6, %p583_p3 }
  0x13   :  { %593 = shalt.err (!%p590_p7)
}
  0x14   :  { %s760_s25 = smov 128   ;;  %s761_s26 = smov 8  }
  0x15   :  { %44 = dma.hbm_to_vmem [thread:$0]  %s999_s1, 256, %s39_s14, [#allocation9], %s760_s25, %s760_s25, %s761_s26  }
  0x16   :  { %s594_s11 = scalar_lea.hbm %s1001_s3, 512 }
  0x17   :  { %p595_p8 = scmp.ne.s32.totalorder %s1001_s3, %s594_s11  ;;  %p598_p9 = scmp.lt.u32.totalorder %s594_s11, %s1001_s3 }
  0x19   :  { %p600_p10 = pnand %p598_p9, %p595_p8 }
  0x1b   :  { %603 = shalt.err (!%p600_p10)
}
  0x1c   :  { %s604_s18 = scalar_lea.vmem %s824_s16, 512  ;;  %p609_p12 = scmp.lt.s32.totalorder %s824_s16, %s824_s16 }
  0x1d   :  { %p605_p11 = scmp.ne.s32.totalorder %s824_s16, %s604_s18  ;;  %p610_p13 = scmp.lt.s32.totalorder %s604_s18, %s604_s18 }
  0x1f   :  { %p611_p0 = por %p610_p13, %p609_p12 }
  0x21   :  { %p612_p1 = pnand %p611_p0, %p605_p11 }
  0x23   :  { %615 = shalt.err (!%p612_p1)
}
  0x24   :  { %68 = dma.hbm_to_vmem [thread:$0]  %s1001_s3, 512, %s824_s16, [#allocation12], %s760_s25, %s760_s25, %s761_s26  }
  0x25   :  { %s762_s19 = smov [#allocation5]   ;;  %s763_s21 = smov [#allocation10]  }
  0x26   :  { %s26_s20 = sshll.u32 %s762_s19, 4  ;;  %s50_s22 = sshll.u32 %s763_s21, 4  ;;  %s27_s20 = int_to_ptr.vmem [resolvable:$true] %s26_s20  ;;  %s861_s22 = int_to_ptr.vmem [resolvable:$true] %s50_s22 }
  0x27   :  { %s616_s27 = scalar_lea.hbm %s998_s0, 256 }
  0x28   :  { %p617_p2 = scmp.ne.s32.totalorder %s998_s0, %s616_s27  ;;  %p620_p3 = scmp.lt.u32.totalorder %s616_s27, %s998_s0 }
  0x2a   :  { %p622_p4 = pnand %p620_p3, %p617_p2 }
  0x2c   :  { %625 = shalt.err (!%p622_p4)
}
  0x2d   :  { %s626_s3 = scalar_lea.vmem %s27_s20, 256  ;;  %p631_p6 = scmp.lt.s32.totalorder %s27_s20, %s27_s20 }
  0x2e   :  { %p627_p5 = scmp.ne.s32.totalorder %s27_s20, %s626_s3  ;;  %p632_p7 = scmp.lt.s32.totalorder %s626_s3, %s626_s3 }
  0x30   :  { %p633_p8 = por %p632_p7, %p631_p6 }
  0x32   :  { %p634_p9 = pnand %p633_p8, %p627_p5 }
  0x34   :  { %637 = shalt.err (!%p634_p9)
}
  0x35   :  { %32 = dma.hbm_to_vmem [thread:$0]  %s998_s0, 256, %s27_s20, [#allocation6], %s760_s25, %s760_s25, %s761_s26  }
  0x36   :  { %s638_s17 = scalar_lea.hbm %s1000_s2, 512 }
  0x37   :  { %p639_p10 = scmp.ne.s32.totalorder %s1000_s2, %s638_s17  ;;  %p642_p11 = scmp.lt.u32.totalorder %s638_s17, %s1000_s2 }
  0x39   :  { %p644_p12 = pnand %p642_p11, %p639_p10 }
  0x3b   :  { %647 = shalt.err (!%p644_p12)
}
  0x3c   :  { %s648_s21 = scalar_lea.vmem %s861_s22, 512  ;;  %p653_p0 = scmp.lt.s32.totalorder %s861_s22, %s861_s22 }
  0x3d   :  { %p649_p13 = scmp.ne.s32.totalorder %s861_s22, %s648_s21  ;;  %p654_p1 = scmp.lt.s32.totalorder %s648_s21, %s648_s21 }
  0x3f   :  { %p655_p2 = por %p654_p1, %p653_p0 }
  0x41   :  { %p656_p3 = pnand %p655_p2, %p649_p13 }
  0x43   :  { %659 = shalt.err (!%p656_p3)
}
  0x44   :  { %56 = dma.hbm_to_vmem [thread:$0]  %s1000_s2, 512, %s861_s22, [#allocation9], %s760_s25, %s760_s25, %s761_s26  }
  0x45   :  { %s764_s23 = smov [#allocation13]   ;;  %s660_s29 = scalar_lea.hbm %s1002_s4, 512 }
  0x46   :  { %s74_s24 = sshll.u32 %s764_s23, 4  ;;  %p661_p4 = scmp.ne.s32.totalorder %s1002_s4, %s660_s29  ;;  %s75_s24 = int_to_ptr.vmem [resolvable:$true] %s74_s24 }
  0x47   :  { %p664_p5 = scmp.lt.u32.totalorder %s660_s29, %s1002_s4 }
  0x49   :  { %p666_p6 = pnand %p664_p5, %p661_p4 }
  0x4b   :  { %669 = shalt.err (!%p666_p6)
}
  0x4c   :  { %s670_s12 = scalar_lea.vmem %s75_s24, 512  ;;  %p675_p8 = scmp.lt.s32.totalorder %s75_s24, %s75_s24 }
  0x4d   :  { %p671_p7 = scmp.ne.s32.totalorder %s75_s24, %s670_s12  ;;  %p676_p9 = scmp.lt.s32.totalorder %s670_s12, %s670_s12 }
  0x4f   :  { %p677_p10 = por %p676_p9, %p675_p8 }
  0x51   :  { %p678_p11 = pnand %p677_p10, %p671_p7 }
  0x53   :  { %681 = shalt.err (!%p678_p11)
}
  0x54   :  { %80 = dma.hbm_to_vmem [thread:$0]  %s1002_s4, 512, %s75_s24, [#allocation12], %s760_s25, %s760_s25, %s761_s26  }
  0x55   :  { %748 = dma.done.wait [#allocation6], 256  }
  0x56   :  { %749 = vsyncadd [#allocation6], 4294967040 }
  0x57   :  { %750 = dma.done.wait [#allocation9], 768  }
  0x58   :  { %751 = vsyncadd [#allocation9], 4294966528 }
  0x59   :  { %752 = dma.done.wait [#allocation12], 1024  }
  0x5a   :  { %753 = vsyncadd [#allocation12], 4294966272  ;;  %vm106_vm0 = vcmask 261120   ;;  %v765_v0 = vmov 0.0   ;;  %v119_v1 = vld [vmem:[#allocation10] sm:$0xff]  ;;  %v120_v2 = vld [vmem:[#allocation10 + $0x8] sm:$0xff] }
  0x5b   :  { %108 = vst.msk [vmem:[#allocation2 + $0x8] sm:$0xff] %vm106_vm0, %v765_v0  ;;  %107 = vst.msk [vmem:[#allocation2] sm:$0xff] %vm106_vm0, %v765_v0  ;;  %v121_v3 = vld [vmem:[#allocation10 + $0x10] sm:$0xff]  ;;  %v537_v4 = vpack.c.bf16 %v120_v2, %v119_v1  ;;  %v122_v5 = vld [vmem:[#allocation10 + $0x18] sm:$0xff]  ;;  %s766_s18 = smov [#allocation14]   ;;  %s767_s14 = smov [#allocation15]  }
  0x5c   :  { %109 = vst.msk [vmem:[#allocation3] sm:$0xff] %vm106_vm0, %v765_v0  ;;  %110 = vst.msk [vmem:[#allocation3 + $0x8] sm:$0xff] %vm106_vm0, %v765_v0  ;;  %v211_v6 = vld [vmem:[#allocation11] sm:$0xff]  ;;  %v212_v7 = vld [vmem:[#allocation11 + $0x8] sm:$0xff]  ;;  %v541_v8 = vpack.c.bf16 %v122_v5, %v121_v3  ;;  %s432_s1 = sshll.u32 %s766_s18, 4  ;;  %s444_s19 = sshll.u32 %s767_s14, 4  ;;  %s433_s1 = int_to_ptr.vmem [resolvable:$true] %s432_s1  ;;  %s937_s19 = int_to_ptr.vmem [resolvable:$true] %s444_s19 }
  0x5d   :  { %111 = vst.msk [vmem:[#allocation4] sm:$0xff] %vm106_vm0, %v765_v0  ;;  %112 = vst.msk [vmem:[#allocation4 + $0x8] sm:$0xff] %vm106_vm0, %v765_v0  ;;  %v545_v9 = vpack.c.bf16 %v212_v7, %v211_v6  ;;  %v113_v10 = vld [vmem:[#allocation5] sm:$0xff]  ;;  %538 = vmatprep.subr.bf16.mxu0 %v537_v4  ;;  %v297_v12 = vld [vmem:[#allocation13 + $0x8] sm:$0xff]  ;;  %s682_s21 = scalar_lea.vmem %s433_s1, 256  ;;  %p687_p13 = scmp.lt.s32.totalorder %s433_s1, %s433_s1 }
  0x5e   :  { %v296_v11 = vld [vmem:[#allocation13] sm:$0xff]  ;;  %512 = vmatprep.mubr.msk.f32.mxu0 %vm106_vm0, %v113_v10  ;;  %v213_v13 = vld [vmem:[#allocation11 + $0x10] sm:$0xff]  ;;  %v214_v14 = vld [vmem:[#allocation11 + $0x18] sm:$0xff]  ;;  %540 = vmatpush3.bf16.msra.mxu0 %v537_v4  ;;  %p683_p12 = scmp.ne.s32.totalorder %s433_s1, %s682_s21  ;;  %p688_p0 = scmp.lt.s32.totalorder %s682_s21, %s682_s21 }
  0x5f   :  { %546 = vmatprep.subr.bf16.mxu1 %v545_v9  ;;  %v549_v15 = vpack.c.bf16 %v214_v14, %v213_v13  ;;  %542 = vmatprep.subr.bf16.mxu0 %v541_v8  ;;  %v553_v16 = vpack.c.bf16 %v297_v12, %v296_v11  ;;  %v298_v17 = vld [vmem:[#allocation13 + $0x10] sm:$0xff]  ;;  %v299_v18 = vld [vmem:[#allocation13 + $0x18] sm:$0xff]  ;;  %v114_v19 = vld [vmem:[#allocation5 + $0x8] sm:$0xff] }
  0x60   :  { %548 = vmatpush3.bf16.msra.mxu1 %v545_v9  ;;  %523 = vmatprep.mubr.msk.f32.mxu1 %vm106_vm0, %v113_v10  ;;  %v557_v20 = vpack.c.bf16 %v299_v18, %v298_v17  ;;  %v115_v21 = vld [vmem:[#allocation8] sm:$0xff]  ;;  %v116_v22 = vld [vmem:[#allocation8 + $0x8] sm:$0xff]  ;;  %p689_p1 = por %p688_p0, %p687_p13 }
  0x61   :  { %550 = vmatprep.subr.bf16.mxu1 %v549_v15  ;;  %v483_v38 = vld [vmem:[%s1003_s5] ss:$0 sm:$0xff] }
  0x62   :  { %544 = vmatpush3.bf16.msra.mxu0 %v541_v8  ;;  %v118_v23 = vld [vmem:[#allocation2 + $0x8] sm:$0xff]  ;;  %v117_v24 = vld [vmem:[#allocation2] sm:$0xff]  ;;  %p690_p2 = pnand %p689_p1, %p683_p12 }
  0x63   :  { %554 = vmatprep.subr.bf16.mxu0 %v553_v16  ;;  %v210_v25 = vld [vmem:[#allocation3 + $0x8] sm:$0xff]  ;;  %v209_v27 = vld [vmem:[#allocation3] sm:$0xff]  ;;  %v484_v41 = vld [vmem:[%s1004_s6] ss:$0 sm:$0xff] }
  0x64   :  { %552 = vmatpush3.bf16.msra.mxu1 %v549_v15  ;;  %v295_v35 = vld [vmem:[#allocation4 + $0x8] sm:$0xff]  ;;  %v294_v36 = vld [vmem:[#allocation4] sm:$0xff] }
  0x65   :  { %513 = vmatmul.mubr.msk.f32.vlgmr.msra.gmra.mrb[0].mxu0 %vm106_vm0, %v114_v19  ;;  %v485_v51 = vld [vmem:[%s1005_s7] ss:$0 sm:$0xff] }
  0x66   :  { %556 = vmatpush3.bf16.msra.mxu0 %v553_v16  ;;  %534 = vmatprep.mubr.msk.f32.mxu0 %vm106_vm0, %v115_v21 }
  0x67   :  { %524 = vmatmul.mubr.msk.f32.vlgmr.msra.gmra.mrb[0].mxu1 %vm106_vm0, %v114_v19  ;;  %558 = vmatprep.subr.bf16.mxu0 %v557_v20 }
  0x6a   :  { %560 = vmatpush3.bf16.msra.mxu0 %v557_v20 }
  0x6d   :  { %535 = vmatmul.mubr.msk.f32.vlgmr.msra.gmra.mrb[2].mxu0 %vm106_vm0, %v116_v22 }
 0x138   :  { %v514_v26 = vpop.f32.mrb[0].mxu0 }
 0x139   :  { %v206_v28 = vadd.f32 %v514_v26, %v118_v23  ;;  %v196_v29 = vpop.f32.mrb[1].mxu0 }
 0x13a   :  { %v525_v30 = vpop.f32.mrb[0].mxu1  ;;  %v205_v31 = vadd.f32 %v196_v29, %v117_v24 }
 0x13b   :  { %v291_v32 = vadd.f32 %v525_v30, %v210_v25  ;;  %v281_v33 = vpop.f32.mrb[1].mxu1  ;;  %208 = vst.msk [vmem:[#allocation2 + $0x8] sm:$0xff] %vm106_vm0, %v206_v28 }
 0x13c   :  { %v290_v34 = vadd.f32 %v281_v33, %v209_v27  ;;  %207 = vst.msk [vmem:[#allocation2] sm:$0xff] %vm106_vm0, %v205_v31 }
 0x13d   :  { %293 = vst.msk [vmem:[#allocation3 + $0x8] sm:$0xff] %vm106_vm0, %v291_v32 }
 0x13e   :  { %292 = vst.msk [vmem:[#allocation3] sm:$0xff] %vm106_vm0, %v290_v34 }
 0x140   :  { %v536_v37 = vpop.f32.mrb[2].mxu0 }
 0x141   :  { %v382_v39 = vadd.f32 %v536_v37, %v295_v35  ;;  %v372_v40 = vpop.f32.mrb[3].mxu0 }
 0x142   :  { %v381_v42 = vadd.f32 %v372_v40, %v294_v36  ;;  %v389_v43 = vld [vmem:[#allocation2 + $0x8] sm:$0xff] }
 0x143   :  { %384 = vst.msk [vmem:[#allocation4 + $0x8] sm:$0xff] %vm106_vm0, %v382_v39  ;;  %v388_v45 = vld [vmem:[#allocation2] sm:$0xff]  ;;  %v398_v46 = vadd.f32 %v483_v38, %v389_v43 }
 0x144   :  { %v402_v44 = vld [vmem:[#allocation3 + $0x8] sm:$0xff]  ;;  %383 = vst.msk [vmem:[#allocation4] sm:$0xff] %vm106_vm0, %v381_v42  ;;  %v397_v49 = vadd.f32 %v483_v38, %v388_v45 }
 0x145   :  { %v401_v47 = vld [vmem:[#allocation3] sm:$0xff]  ;;  %v411_v48 = vadd.f32 %v484_v41, %v402_v44  ;;  %400 = vst.msk [vmem:[#allocation14 + $0x8] sm:$0xff] %vm106_vm0, %v398_v46 }
 0x146   :  { %v410_v50 = vadd.f32 %v484_v41, %v401_v47  ;;  %399 = vst.msk [vmem:[#allocation14] sm:$0xff] %vm106_vm0, %v397_v49 }
 0x147   :  { %413 = vst.msk [vmem:[#allocation15 + $0x8] sm:$0xff] %vm106_vm0, %v411_v48 }
 0x148   :  { %412 = vst.msk [vmem:[#allocation15] sm:$0xff] %vm106_vm0, %v410_v50 }
 0x149   :  { %693 = shalt.err (!%p690_p2)
}
 0x14a   :  { %s694_s23 = scalar_lea.hbm %s1006_s8, 256 }
 0x14b   :  { %p695_p3 = scmp.ne.s32.totalorder %s1006_s8, %s694_s23  ;;  %p698_p4 = scmp.lt.u32.totalorder %s694_s23, %s1006_s8 }
 0x14d   :  { %p700_p5 = pnand %p698_p4, %p695_p3 }
 0x14f   :  { %703 = shalt.err (!%p700_p5)
}
 0x150   :  { %438 = dma.vmem_to_hbm [thread:$0]  %s433_s1, 256, %s1006_s8, [#allocation7], %s760_s25, %s760_s25, %s761_s26  }
 0x151   :  { %s704_s11 = scalar_lea.vmem %s937_s19, 256  ;;  %p709_p7 = scmp.lt.s32.totalorder %s937_s19, %s937_s19 }
 0x152   :  { %p705_p6 = scmp.ne.s32.totalorder %s937_s19, %s704_s11  ;;  %p710_p8 = scmp.lt.s32.totalorder %s704_s11, %s704_s11 }
 0x154   :  { %p711_p9 = por %p710_p8, %p709_p7 }
 0x156   :  { %p712_p10 = pnand %p711_p9, %p705_p6 }
 0x158   :  { %715 = shalt.err (!%p712_p10)
}
 0x159   :  { %s716_s12 = scalar_lea.hbm %s1007_s9, 256 }
 0x15a   :  { %p717_p11 = scmp.ne.s32.totalorder %s1007_s9, %s716_s12  ;;  %p720_p12 = scmp.lt.u32.totalorder %s716_s12, %s1007_s9 }
 0x15c   :  { %p722_p13 = pnand %p720_p12, %p717_p11 }
 0x15e   :  { %725 = shalt.err (!%p722_p13)
}
 0x15f   :  { %450 = dma.vmem_to_hbm [thread:$0]  %s937_s19, 256, %s1007_s9, [#allocation16], %s760_s25, %s760_s25, %s761_s26   ;;  %v415_v52 = vld [vmem:[#allocation4 + $0x8] sm:$0xff]  ;;  %v414_v53 = vld [vmem:[#allocation4] sm:$0xff] }
 0x160   :  { %s768_s17 = smov [#allocation17]   ;;  %v424_v54 = vadd.f32 %v485_v51, %v415_v52  ;;  %v423_v55 = vadd.f32 %v485_v51, %v414_v53 }
 0x161   :  { %s456_s18 = sshll.u32 %s768_s17, 4  ;;  %s457_s18 = int_to_ptr.vmem [resolvable:$true] %s456_s18 }
 0x162   :  { %426 = vst.msk [vmem:[#allocation17 + $0x8] sm:$0xff] %vm106_vm0, %v424_v54  ;;  %425 = vst.msk [vmem:[#allocation17] sm:$0xff] %vm106_vm0, %v423_v55  ;;  %s726_s1 = scalar_lea.vmem %s457_s18, 256  ;;  %p731_p1 = scmp.lt.s32.totalorder %s457_s18, %s457_s18 }
 0x163   :  { %p727_p0 = scmp.ne.s32.totalorder %s457_s18, %s726_s1  ;;  %p732_p2 = scmp.lt.s32.totalorder %s726_s1, %s726_s1 }
 0x165   :  { %p733_p3 = por %p732_p2, %p731_p1 }
 0x167   :  { %p734_p4 = pnand %p733_p3, %p727_p0 }
 0x169   :  { %737 = shalt.err (!%p734_p4)
}
 0x16a   :  { %s738_s19 = scalar_lea.hbm %s1008_s10, 256 }
 0x16b   :  { %p739_p5 = scmp.ne.s32.totalorder %s1008_s10, %s738_s19  ;;  %p742_p6 = scmp.lt.u32.totalorder %s738_s19, %s1008_s10 }
 0x16d   :  { %p744_p7 = pnand %p742_p6, %p739_p5 }
 0x16f   :  { %747 = shalt.err (!%p744_p7)
}
 0x170   :  { %462 = dma.vmem_to_hbm [thread:$0]  %s457_s18, 256, %s1008_s10, [#allocation16], %s760_s25, %s760_s25, %s761_s26  }
 0x171   :  { %754 = dma.done.wait [#allocation7], 256  }
 0x172   :  { %755 = vsyncadd [#allocation7], 4294967040 }
 0x173   :  { %756 = dma.done.wait [#allocation16], 512  }
 0x174   :  { %757 = vsyncadd [#allocation16], 4294966784 }
 0x175   :  { %472 = vsyncpa [#allocation6], 1 }
 0x176   :  { %473 = vsyncpa [#allocation9], 1 }
 0x177   :  { %474 = vsyncpa [#allocation12], 1 }
 0x178   :  { %475 = vsyncpa [#allocation7], 1 }
 0x179   :  { %476 = vsyncpa [#allocation16], 1 }

</bundles_post_ra>
